<compile_context>
chip_gen: v7x
topology: tpu7x:2x2x1
jax: 0.10.0
libtpu: 0.0.40
codegen_flags: <defaults>
</compile_context>

<pallas_src>
import functools

import jax
import jax.numpy as jnp
from jax.experimental import pallas as pl
from jax.experimental.pallas import tpu as pltpu


def _round_up(x, m):
    return (x + m - 1) // m * m


def _zero_pad_last(x, left, right):
    """Zero-pad the last axis of a (register-resident) value."""
    parts = []
    if left > 0:
        parts.append(jnp.zeros(x.shape[:-1] + (left,), x.dtype))
    parts.append(x)
    if right > 0:
        parts.append(jnp.zeros(x.shape[:-1] + (right,), x.dtype))
    if len(parts) == 1:
        return x
    return jnp.concatenate(parts, axis=-1)


def _maxpool1d_same_kernel(x_ref, o_ref, *, kernel_size, stride, out_len,
                           pad_left, length):
    """One (rows_block, L) unpadded tile -> (rows_block, out_len)."""
    K, S = kernel_size, stride
    x = x_ref[...]                                  # (R, L)
    R = x.shape[0]

    if S == 1:
        # Dense sliding max: K unit-stride shifted maxes on the padded signal.
        padded = out_len + K - 1                    # == L + p
        xp = _zero_pad_last(x, pad_left, padded - length - pad_left)
        acc = xp[:, 0:out_len]
        for k in range(1, K):
            acc = jnp.maximum(acc, xp[:, k:k + out_len])
        o_ref[...] = acc.astype(o_ref.dtype)
        return

    # General strided case: group the padded lane axis into (G, S).
    # Window o covers groups o .. o+Q fully except a prefix of length P in
    # the last group:  out[o] = max(full[o..o+Q-1], prefix[o+Q]).
    Q = (K - 1) // S                                # fully covered extra groups
    P = K - Q * S                                   # prefix length, 1 <= P <= S
    G = out_len + Q
    total = G * S
    xp = _zero_pad_last(x, pad_left, total - length - pad_left)
    g = xp.reshape(R, G, S)

    pre = g[:, :, 0:P].max(axis=-1)                 # (R, G) prefix maxes
    if Q == 0:
        acc = pre[:, 0:out_len]
    else:
        full = g.max(axis=-1) if P != S else pre    # (R, G) full-group maxes
        acc = full[:, 0:out_len]
        for q in range(1, Q):
            acc = jnp.maximum(acc, full[:, q:q + out_len])
        acc = jnp.maximum(acc, pre[:, Q:Q + out_len])

    o_ref[...] = acc.astype(o_ref.dtype)


def my_max_pool1d_pad_same(x, kernel_size, stride=1):
    """Matches MyMaxPool1dPadSame.forward for x of shape (N, C, L)."""
    N, C, L = x.shape
    K, S = int(kernel_size), int(stride)
    out_len = -(-L // S)                                    # ceil(L / S)
    p = max(0, (out_len - 1) * S + K - L)                   # SAME zero padding
    pad_left = p // 2

    rows = N * C
    x2 = x.reshape(rows, L)

    itemsize = jnp.dtype(x.dtype).itemsize
    # Row tile: multiple of 8 sublanes, ~2 MiB of input per block (fits all
    # generations' VMEM with double-buffering, incl. v7x's 64 MiB).
    target_bytes = 2 * 1024 * 1024
    rows_target = max(8, (target_bytes // max(L * itemsize, 1)) // 8 * 8)
    block_rows = min(rows_target, _round_up(rows, 8))
    rows_padded = _round_up(rows, block_rows)
    if rows_padded != rows:
        x2 = jnp.pad(x2, ((0, rows_padded - rows), (0, 0)))
    # TODO(synk): for extremely long L (8 rows * L * itemsize >> a few MiB) the
    # length axis should also be tiled with a (kernel_size-1) halo.

    grid = (rows_padded // block_rows,)

    kernel = functools.partial(
        _maxpool1d_same_kernel,
        kernel_size=K, stride=S, out_len=out_len, pad_left=pad_left, length=L)

    cost = pl.CostEstimate(
        flops=K * rows_padded * out_len,
        transcendentals=0,
        bytes_accessed=(rows_padded * L + rows_padded * out_len) * itemsize)

    out = pl.pallas_call(
        kernel,
        out_shape=jax.ShapeDtypeStruct((rows_padded, out_len), x.dtype),
        grid_spec=pltpu.PrefetchScalarGridSpec(
            num_scalar_prefetch=0,
            grid=grid,
            in_specs=[pl.BlockSpec((block_rows, L), lambda i: (i, 0))],
            out_specs=pl.BlockSpec((block_rows, out_len), lambda i: (i, 0)),
        ),
        compiler_params=pltpu.CompilerParams(
            dimension_semantics=("parallel",),
            vmem_limit_bytes=32 * 1024 * 1024),
        cost_estimate=cost,
    )(x2)

    return out[:rows].reshape(N, C, out_len)


def _reference_maxpool1d_same(x, kernel_size, stride):
    """Pure-JAX reference (gather-based) for correctness checking."""
    N, C, L = x.shape
    out_len = -(-L // stride)
    p = max(0, (out_len - 1) * stride + kernel_size - L)
    x_pad = jnp.pad(x, ((0, 0), (0, 0), (p // 2, p - p // 2)))
    idx = jnp.arange(out_len)[:, None] * stride + jnp.arange(kernel_size)[None, :]
    return x_pad[:, :, idx].max(axis=-1)


if __name__ == "__main__":
    key = jax.random.PRNGKey(0)
    N, C, L = 2, 4, 16
    x = jax.random.normal(key, (N, C, L), dtype=jnp.float32)

    # Exercise all kernel branches: K>S (strided), K<=S, stride==1 (dense).
    for kernel_size, stride in [(3, 2), (2, 4), (3, 1), (5, 2)]:
        out = my_max_pool1d_pad_same(x, kernel_size=kernel_size, stride=stride)
        out = jax.block_until_ready(out)
        ref = _reference_maxpool1d_same(x, kernel_size, stride)
        assert out.shape == ref.shape, (kernel_size, stride, out.shape, ref.shape)
        assert jnp.allclose(out, ref), (
            f"Pallas maxpool mismatch vs reference (K={kernel_size}, S={stride})")

    print("KERNEL_OK")
</pallas_src>

<mosaic_0001>
module attributes {stable_mosaic.version = 11 : i64} {
  func.func @_maxpool1d_same_kernel(%arg0: i32, %arg1: memref<8x16xf32, #tpu.memory_space<vmem>>, %arg2: memref<8x8xf32, #tpu.memory_space<vmem>>) attributes {dimension_semantics = [#tpu.dimension_semantics<parallel>], iteration_bounds = array<i64: 1>, scalar_prefetch = 0 : i64, scratch_operands = 0 : i64, tpu.core_type = #tpu.core_type<tc>, window_params = [{transform_indices = @transform_0, window_bounds = array<i64: 8, 16>}, {transform_indices = @transform_1, window_bounds = array<i64: 8, 8>}]} {
    %c0 = arith.constant 0 : index
    %c0_0 = arith.constant 0 : index
    %0 = vector.load %arg1[%c0, %c0_0] : memref<8x16xf32, #tpu.memory_space<vmem>>, vector<8x16xf32>
    %cst = arith.constant 0.000000e+00 : f32
    %1 = vector.broadcast %cst : f32 to vector<8x2xf32>
    %2 = tpu.concatenate %0, %1 in 1 : vector<8x16xf32>, vector<8x2xf32> -> vector<8x18xf32>
    %3 = vector.shape_cast %2 : vector<8x18xf32> to vector<8x9x2xf32>
    %4 = vector.extract_strided_slice %3 {offsets = [0, 0, 0], sizes = [8, 9, 1], strides = [1, 1, 1]} : vector<8x9x2xf32> to vector<8x9x1xf32>
    %cst_1 = arith.constant dense<0xFF800000> : vector<8x9xf32>
    %5 = vector.multi_reduction <maximumf>, %4, %cst_1 [2] : vector<8x9x1xf32> to vector<8x9xf32>
    %cst_2 = arith.constant dense<0xFF800000> : vector<8x9xf32>
    %6 = vector.multi_reduction <maximumf>, %3, %cst_2 [2] : vector<8x9x2xf32> to vector<8x9xf32>
    %7 = vector.extract_strided_slice %6 {offsets = [0, 0], sizes = [8, 8], strides = [1, 1]} : vector<8x9xf32> to vector<8x8xf32>
    %8 = vector.extract_strided_slice %5 {offsets = [0, 1], sizes = [8, 8], strides = [1, 1]} : vector<8x9xf32> to vector<8x8xf32>
    %9 = arith.maximumf %7, %8 : vector<8x8xf32>
    %c0_3 = arith.constant 0 : index
    %c0_4 = arith.constant 0 : index
    %10 = vector.load %arg2[%c0_3, %c0_4] : memref<8x8xf32, #tpu.memory_space<vmem>>, vector<8x8xf32>
    tpu.vector_store %arg2[%c0_3, %c0_4], %9 {strides = array<i32>} : memref<8x8xf32, #tpu.memory_space<vmem>>, vector<8x8xf32>,
    return
  }
  func.func @transform_0(%arg0: i32) -> (i32, i32) {
    %c0_i32 = arith.constant 0 : i32
    %c0_i32_0 = arith.constant 0 : i32
    return %arg0, %c0_i32 : i32, i32
  }
  func.func @transform_1(%arg0: i32) -> (i32, i32) {
    %c0_i32 = arith.constant 0 : i32
    %c0_i32_0 = arith.constant 0 : i32
    return %arg0, %c0_i32 : i32, i32
  }
}

</mosaic_0001>

<bundles_post_ra>
// kernel: tpu_custom_call.1
= control target key start
LH: loop header
LB: loop body
LE: loop exit
PB: predicated region body
PF: predicated region fallthrough
CT: control target
= control target key end

     0   :  { %6 = vsyncpa [#allocation3], 0  ;;  %s615_s0 = inlined_call_operand.hbm [shape: f32[8,16], index: 0, kind: input, shape index: {}]   ;;  %s616_s1 = inlined_call_operand.hbm [shape: f32[8,8], index: 1, kind: output, shape index: {}]  }
   0x1   :  { %7 = vsyncpa [#allocation4], 0  ;;  %s478_s6 = smov [#allocation2]   ;;  %s430_s10 = scalar_lea.hbm %s615_s0, 128 }
   0x2   :  { %s14_s7 = sshll.u32 %s478_s6, 4  ;;  %p431_p0 = scmp.ne.s32.totalorder %s615_s0, %s430_s10  ;;  %s15_s7 = int_to_ptr.vmem [resolvable:$true] %s14_s7 }
   0x3   :  { %p434_p1 = scmp.lt.u32.totalorder %s430_s10, %s615_s0 }
   0x5   :  { %p436_p2 = pnand %p434_p1, %p431_p0 }
   0x7   :  { %439 = shalt.err (!%p436_p2)
}
   0x8   :  { %s440_s15 = scalar_lea.vmem %s15_s7, 128  ;;  %p445_p4 = scmp.lt.s32.totalorder %s15_s7, %s15_s7 }
   0x9   :  { %p441_p3 = scmp.ne.s32.totalorder %s15_s7, %s440_s15  ;;  %p446_p5 = scmp.lt.s32.totalorder %s440_s15, %s440_s15 }
   0xb   :  { %p447_p6 = por %p446_p5, %p445_p4 }
   0xd   :  { %p448_p7 = pnand %p447_p6, %p441_p3 }
   0xf   :  { %451 = shalt.err (!%p448_p7)
}
  0x10   :  { %17 = dma.hbm_to_vmem [thread:$0]  %s615_s0, 128, %s15_s7, [#allocation3]  }
  0x11   :  { %474 = dma.done.wait [#allocation3], 128  }
  0x12   :  { %475 = vsyncadd [#allocation3], 4294967168  ;;  %vm22_vm0 = vcmask 130048   ;;  %v21_v0 = vld [vmem:[#allocation2] sm:$0xff]  ;;  %s479_s18 = smov 122   ;;  %s480_s19 = smov 126   ;;  %v54_v6 = vlaneseq }
  0x13   :  { %v514_v1 = vsel %vm22_vm0, %v21_v0, 0.0  ;;  %s481_s20 = smov 120   ;;  %s482_s21 = smov 124   ;;  %v486_v4 = vmov 1983009808   ;;  %vm234_vm1 = vcmask 15360  }
  0x14   :  { %31 = vrot.lane.b32.xlu1 %v514_v1, %s479_s18  ;;  %25 = vrot.lane.b32.xlu0 %v514_v1, %s480_s19  ;;  %s483_s22 = smov 116   ;;  %s484_s0 = smov 118   ;;  %v52_v5 = vunpack.c.l.s4 %v486_v4  ;;  %v524_v10 = vshrl.u32 %v54_v6, 7  ;;  %v487_v11 = vmov 1934713408   ;;  %v489_v4 = vmov 0  }
  0x15   :  { %s485_s23 = smov 114   ;;  %v116_v12 = vunpack.c.l.s4 %v487_v11  ;;  %s488_s24 = smov 112   ;;  %428 = vset.pattern.permute.xlu1 %v489_v4  ;;  %429 = vset.pattern.permute.xlu0 %v489_v4  ;;  %vm275_vm2 = vcmask 1046528   ;;  %vm382_vm3 = vcmask 1041409   ;;  %vm384_vm4 = vcmask 1042434  }
  0x16   :  { %v53_v9 = vunpack.c.0.s8 %v52_v5  ;;  %vm386_vm5 = vcmask 1043459   ;;  %vm388_vm6 = vcmask 1044484   ;;  %vm390_vm7 = vcmask 1045509   ;;  %s491_s25 = smov [#allocation5]  }
  0x17   :  { %v117_v18 = vunpack.c.0.s8 %v116_v12  ;;  %v490_v12 = vmov 0.0   ;;  %vm392_vm8 = vcmask 1046534   ;;  %s405_s26 = sshll.u32 %s491_s25, 4  ;;  %vm394_vm9 = vcmask 1047559   ;;  %s406_s26 = int_to_ptr.vmem [resolvable:$true] %s405_s26 }
  0x18   :  { %34 = vrot.lane.b32.xlu1 %v514_v1, %s481_s20  ;;  %28 = vrot.lane.b32.xlu0 %v514_v1, %s482_s21  ;;  %v528_v16 = vsub.s32 %v53_v9, %v524_v10  ;;  %vm397_vm10 = vcmask 64512   ;;  %s452_s27 = scalar_lea.vmem %s406_s26, 128  ;;  %p457_p9 = scmp.lt.s32.totalorder %s406_s26, %s406_s26 }
  0x19   :  { %v534_v27 = vsub.s32 %v117_v18, %v524_v10  ;;  %p453_p8 = scmp.ne.s32.totalorder %s406_s26, %s452_s27  ;;  %p458_p10 = scmp.lt.s32.totalorder %s452_s27, %s452_s27 }
  0x1b   :  { %p459_p11 = por %p458_p10, %p457_p9 }
  0x1c   :  { %40 = vrot.lane.b32.xlu1 %v514_v1, %s483_s22  ;;  %37 = vrot.lane.b32.xlu0 %v514_v1, %s484_s0 }
  0x1d   :  { %p460_p12 = pnand %p459_p11, %p453_p8 }
  0x20   :  { %43 = vrot.lane.b32.xlu0 %v514_v1, %s485_s23 }
  0x86   :  { %v32_v2 = vpop.permute.xlu1 %31  ;;  %v26_v3 = vpop.permute.xlu0 %25 }
  0x87   :  { %v65_v17 = vcombine.low %v26_v3, %v32_v2  ;;  %v66_v28 = vcombine.high %v26_v3, %v32_v2 }
  0x89   :  { %v73_v23 = vrot.slane %v65_v17, %v528_v16  ;;  %v80_v39 = vrot.slane %v66_v28, %v528_v16 }
  0x8a   :  { %v35_v7 = vpop.permute.xlu1 %34  ;;  %v29_v8 = vpop.permute.xlu0 %28 }
  0x8b   :  { %v49_v13 = vcombine.low %v514_v1, %v29_v8  ;;  %v50_v24 = vcombine.high %v514_v1, %v29_v8 }
  0x8d   :  { %v57_v19 = vrot.slane %v49_v13, %v528_v16  ;;  %v64_v34 = vrot.slane %v50_v24, %v528_v16 }
  0x8e   :  { %v41_v14 = vpop.permute.xlu1 %40  ;;  %v38_v15 = vpop.permute.xlu0 %37 }
  0x8f   :  { %v81_v20 = vcombine.low %v35_v7, %v41_v14  ;;  %v82_v21 = vcombine.high %v35_v7, %v41_v14  ;;  %v113_v29 = vcombine.low %v57_v19, %v73_v23  ;;  %v114_v35 = vcombine.high %v57_v19, %v73_v23 }
  0x90   :  { %v129_v43 = vcombine.low %v64_v34, %v80_v39  ;;  %v130_v53 = vcombine.high %v64_v34, %v80_v39 }
  0x91   :  { %v89_v30 = vrot.slane %v81_v20, %v528_v16  ;;  %v96_v33 = vrot.slane %v82_v21, %v528_v16  ;;  %v121_v40 = vrot.slane %v113_v29, %v534_v27  ;;  %v128_v46 = vrot.slane %v114_v35, %v534_v27 }
  0x92   :  { %v44_v22 = vpop.permute.xlu0 %43  ;;  %v137_v54 = vrot.slane %v129_v43, %v534_v27  ;;  %v144_v60 = vrot.slane %v130_v53, %v534_v27 }
  0x93   :  { %v97_v25 = vcombine.low %v38_v15, %v44_v22  ;;  %v98_v26 = vcombine.high %v38_v15, %v44_v22 }
  0x95   :  { %v105_v31 = vrot.slane %v97_v25, %v528_v16  ;;  %v112_v32 = vrot.slane %v98_v26, %v528_v16 }
  0x97   :  { %v145_v36 = vcombine.low %v89_v30, %v105_v31  ;;  %v146_v37 = vcombine.high %v89_v30, %v105_v31  ;;  %v161_v38 = vcombine.low %v96_v33, %v112_v32  ;;  %v162_v47 = vcombine.high %v96_v33, %v112_v32 }
  0x99   :  { %v153_v41 = vrot.slane %v145_v36, %v534_v27  ;;  %v160_v42 = vrot.slane %v146_v37, %v534_v27  ;;  %v169_v48 = vrot.slane %v161_v38, %v534_v27  ;;  %v176_v55 = vrot.slane %v162_v47, %v534_v27 }
  0x9b   :  { %v545_v44 = vcombine.high %v121_v40, %v153_v41  ;;  %v177_v45 = vcombine.low %v121_v40, %v153_v41  ;;  %v552_v51 = vcombine.low %v128_v46, %v160_v42  ;;  %v554_v52 = vcombine.high %v128_v46, %v160_v42 }
  0x9c   :  { %v562_v58 = vcombine.low %v137_v54, %v169_v48  ;;  %v564_v59 = vcombine.high %v137_v54, %v169_v48  ;;  %v571_v63 = vcombine.low %v144_v60, %v176_v55  ;;  %v575_v2 = vcombine.high %v144_v60, %v176_v55 }
  0x9d   :  { %v238_v49 = vsel %vm234_vm1, %v545_v44, -inf  ;;  %v235_v50 = vsel %vm234_vm1, %v177_v45, -inf  ;;  %v241_v56 = vsel %vm234_vm1, %v552_v51, -inf  ;;  %v244_v57 = vsel %vm234_vm1, %v554_v52, -inf }
  0x9e   :  { %239 = vmax.xlane.f32.xlu0 %v238_v49  ;;  %236 = vmax.xlane.f32.xlu1 %v235_v50  ;;  %v247_v61 = vsel %vm234_vm1, %v562_v58, -inf  ;;  %v250_v62 = vsel %vm234_vm1, %v564_v59, -inf  ;;  %v253_v0 = vsel %vm234_vm1, %v571_v63, -inf  ;;  %v256_v3 = vsel %vm234_vm1, %v575_v2, -inf }
  0x9f   :  { %v276_v23 = vrot.slane %v177_v45, 1  ;;  %v279_v25 = vrot.slane %v545_v44, 1  ;;  %v282_v32 = vrot.slane %v552_v51, 1  ;;  %v285_v34 = vrot.slane %v554_v52, 1 }
  0xa0   :  { %v288_v43 = vrot.slane %v562_v58, 1  ;;  %v291_v44 = vrot.slane %v564_v59, 1  ;;  %v294_v52 = vrot.slane %v571_v63, 1  ;;  %v297_v53 = vrot.slane %v575_v2, 1 }
  0xa2   :  { %242 = vmax.xlane.f32.xlu0 %v241_v56  ;;  %245 = vmax.xlane.f32.xlu1 %v244_v57 }
  0xa6   :  { %248 = vmax.xlane.f32.xlu0 %v247_v61  ;;  %251 = vmax.xlane.f32.xlu1 %v250_v62  ;;  %v349_v61 = vand.u32 127, %v54_v6 }
  0xa8   :  { %v352_v62 = vsub.s32 %v349_v61, %v524_v10 }
  0xaa   :  { %254 = vmax.xlane.f32.xlu1 %v253_v0 }
  0xae   :  { %257 = vmax.xlane.f32.xlu1 %v256_v3 }
  0xbc   :  { %46 = vrot.lane.b32.xlu0 %v514_v1, %s488_s24 }
 0x12b   :  { %v240_v5 = vpop.xlane.xlu0 %239  ;;  %v237_v9 = vpop.xlane.xlu1 %236 }
 0x12f   :  { %v243_v7 = vpop.xlane.xlu0 %242  ;;  %v246_v19 = vpop.xlane.xlu1 %245 }
 0x133   :  { %v249_v8 = vpop.xlane.xlu0 %248  ;;  %v252_v35 = vpop.xlane.xlu1 %251 }
 0x137   :  { %v47_v11 = vpop.permute.xlu0 %46  ;;  %v255_v49 = vpop.xlane.xlu1 %254 }
 0x138   :  { %v185_v13 = vcombine.high %v47_v11, %v490_v12  ;;  %v192_v14 = vrot.slane %v47_v11, %v528_v16 }
 0x13a   :  { %v199_v15 = vrot.slane %v185_v13, %v528_v16  ;;  %v200_v17 = vcombine.high %v192_v14, %v490_v12  ;;  %v207_v18 = vrot.slane %v192_v14, %v534_v27 }
 0x13b   :  { %v258_v59 = vpop.xlane.xlu1 %257 }
 0x13c   :  { %v214_v1 = vrot.slane %v200_v17, %v534_v27  ;;  %v215_v20 = vcombine.high %v199_v15, %v490_v12  ;;  %v222_v21 = vrot.slane %v199_v15, %v534_v27  ;;  %v230_v22 = vcombine.high %v207_v18, %v490_v12 }
 0x13d   :  { %v277_v24 = vrot.slane %v207_v18, 1 }
 0x13e   :  { %v231_v26 = vcombine.high %v214_v1, %v490_v12  ;;  %v280_v28 = vrot.slane %v230_v22, 1  ;;  %v229_v29 = vrot.slane %v215_v20, %v534_v27  ;;  %v232_v16 = vcombine.high %v222_v21, %v490_v12 }
 0x13f   :  { %v283_v30 = vrot.slane %v214_v1, 1  ;;  %v278_v31 = vsel %vm275_vm2, %v276_v23, %v277_v24  ;;  %v289_v38 = vrot.slane %v222_v21, 1 }
 0x140   :  { %v286_v33 = vrot.slane %v231_v26, 1  ;;  %v308_v36 = vmax.f32 %v237_v9, %v278_v31  ;;  %v281_v37 = vsel %vm275_vm2, %v279_v25, %v280_v28  ;;  %v292_v41 = vrot.slane %v232_v16, 1 }
 0x141   :  { %v309_v39 = vmax.f32 %v240_v5, %v281_v37  ;;  %v284_v40 = vsel %vm275_vm2, %v282_v32, %v283_v30  ;;  %v233_v42 = vcombine.high %v229_v29, %v490_v12  ;;  %v295_v46 = vrot.slane %v229_v29, 1 }
 0x142   :  { %325 = vperm.xlu1 %428, %v308_v36   ;;  %v287_v27 = vsel %vm275_vm2, %v285_v34, %v286_v33  ;;  %v310_v45 = vmax.f32 %v243_v7, %v284_v40  ;;  %v290_v48 = vsel %vm275_vm2, %v288_v43, %v289_v38  ;;  %v293_v51 = vsel %vm275_vm2, %v291_v44, %v292_v41 }
 0x143   :  { %328 = vperm.xlu0 %429, %v309_v39   ;;  %v311_v47 = vmax.f32 %v246_v19, %v287_v27  ;;  %v298_v50 = vrot.slane %v233_v42, 1  ;;  %v312_v54 = vmax.f32 %v249_v8, %v290_v48  ;;  %v296_v55 = vsel %vm275_vm2, %v294_v52, %v295_v46 }
 0x144   :  { %v313_v56 = vmax.f32 %v252_v35, %v293_v51  ;;  %v314_v58 = vmax.f32 %v255_v49, %v296_v55 }
 0x145   :  { %v299_v57 = vsel %vm275_vm2, %v297_v53, %v298_v50 }
 0x146   :  { %331 = vperm.xlu1 %428, %v310_v45   ;;  %v315_v60 = vmax.f32 %v258_v59, %v299_v57 }
 0x147   :  { %334 = vperm.xlu0 %429, %v311_v47  }
 0x14a   :  { %337 = vperm.xlu1 %428, %v312_v54  }
 0x14b   :  { %340 = vperm.xlu0 %429, %v313_v56  }
 0x14e   :  { %343 = vperm.xlu1 %428, %v314_v58  }
 0x14f   :  { %346 = vperm.xlu0 %429, %v315_v60  }
 0x1c1   :  { %v326_v63 = vpop.permute.xlu1 %325 }
 0x1c2   :  { %v329_v0 = vpop.permute.xlu0 %328  ;;  %v353_v2 = vrot.slane %v326_v63, %v352_v62 }
 0x1c3   :  { %v357_v3 = vrot.slane %v329_v0, %v352_v62 }
 0x1c5   :  { %v383_v4 = vsel %vm382_vm3, %v357_v3, %v353_v2  ;;  %v332_v5 = vpop.permute.xlu1 %331 }
 0x1c6   :  { %v361_v7 = vrot.slane %v332_v5, %v352_v62  ;;  %v335_v8 = vpop.permute.xlu0 %334 }
 0x1c7   :  { %v365_v9 = vrot.slane %v335_v8, %v352_v62 }
 0x1c8   :  { %v385_v11 = vsel %vm384_vm4, %v361_v7, %v383_v4 }
 0x1c9   :  { %v387_v12 = vsel %vm386_vm5, %v365_v9, %v385_v11  ;;  %v338_v13 = vpop.permute.xlu1 %337 }
 0x1ca   :  { %v369_v14 = vrot.slane %v338_v13, %v352_v62  ;;  %v341_v6 = vpop.permute.xlu0 %340 }
 0x1cb   :  { %v373_v10 = vrot.slane %v341_v6, %v352_v62 }
 0x1cc   :  { %v389_v15 = vsel %vm388_vm6, %v369_v14, %v387_v12 }
 0x1cd   :  { %v391_v17 = vsel %vm390_vm7, %v373_v10, %v389_v15  ;;  %v344_v18 = vpop.permute.xlu1 %343 }
 0x1ce   :  { %v377_v19 = vrot.slane %v344_v18, %v352_v62  ;;  %v347_v1 = vpop.permute.xlu0 %346 }
 0x1cf   :  { %v381_v20 = vrot.slane %v347_v1, %v352_v62 }
 0x1d0   :  { %v393_v21 = vsel %vm392_vm8, %v377_v19, %v391_v17 }
 0x1d1   :  { %v395_v22 = vsel %vm394_vm9, %v381_v20, %v393_v21 }
 0x1d2   :  { %398 = vst.msk [vmem:[#allocation5] sm:$0xff] %vm397_vm10, %v395_v22 }
 0x1d3   :  { %463 = shalt.err (!%p460_p12)
}
 0x1d4   :  { %s464_s30 = scalar_lea.hbm %s616_s1, 128 }
 0x1d5   :  { %p465_p13 = scmp.ne.s32.totalorder %s616_s1, %s464_s30  ;;  %p468_p0 = scmp.lt.u32.totalorder %s464_s30, %s616_s1 }
 0x1d7   :  { %p470_p1 = pnand %p468_p0, %p465_p13 }
 0x1d9   :  { %473 = shalt.err (!%p470_p1)
}
 0x1da   :  { %408 = dma.vmem_to_hbm [thread:$0]  %s406_s26, 128, %s616_s1, [#allocation4]  }
 0x1db   :  { %476 = dma.done.wait [#allocation4], 128  }
 0x1dc   :  { %477 = vsyncadd [#allocation4], 4294967168 }
 0x1dd   :  { %412 = vsyncpa [#allocation3], 1 }
 0x1de   :  { %413 = vsyncpa [#allocation4], 1 }

</bundles_post_ra>
